<compile_context>
chip_gen: v7x
topology: tpu7x:2x2x1
jax: 0.10.0
libtpu: 0.0.40
codegen_flags: <defaults>
</compile_context>

<pallas_src>
import functools

import jax
import jax.numpy as jnp
from jax import lax
from jax.experimental import pallas as pl
from jax.experimental.pallas import tpu as pltpu


LANE = 128                         # pad output channels to a multiple of this
SUBLANE = 8                        # pad K (reduction dim) to a multiple of this
VMEM_BUDGET = 20 * 1024 * 1024     # double-buffered working-set budget (bytes)
VMEM_LIMIT = 32 * 1024 * 1024      # scoped VMEM limit handed to Mosaic


def _round_up(x, n):
    return (x + n - 1) // n * n


def _matmul_bias_act_kernel(x_ref, w_ref, b_ref, o_ref, *, apply_relu):
    """One (TM, K) x (K, Cp) tile: MXU matmul, f32 accumulate, +bias, ReLU."""
    acc = jnp.dot(x_ref[...], w_ref[...], preferred_element_type=jnp.float32)
    acc = acc + b_ref[...]                    # (1, Cp) broadcasts over TM rows
    if apply_relu:
        acc = jnp.maximum(acc, 0.0)
    o_ref[...] = acc.astype(o_ref.dtype)


def _pick_tile_m(m, kp, cp, out_itemsize):
    """Largest TM (multiple of 16, <= 512) whose double-buffered working set
    fits the conservative VMEM budget (valid on v5e/v6e/v7x)."""
    tm = min(512, _round_up(m, 16))

    def working_set(t):
        return (2 * t * kp * 2              # x tile, bf16, double buffered
                + 2 * kp * cp * 2           # weight, bf16, double buffered
                + 2 * t * cp * out_itemsize  # out tile, double buffered
                + cp * 4)                   # bias

    while tm > 16 and working_set(tm) > VMEM_BUDGET:
        tm //= 2
    return tm


def _im2col_nhwc(x_nhwc, kernel_size, stride, padding, k_padded):
    """(N,H,W,C) -> (N,Hout,Wout,k_padded) patches.  Last dim is ordered
    (c, kh, kw) to match PyTorch's OIHW weight flattening and zero-padded to
    k_padded columns.  Done in bf16 to halve HBM traffic of the expansion."""
    n, h, w, c = x_nhwc.shape
    k = kernel_size
    hout = (h + 2 * padding - k) // stride + 1
    wout = (w + 2 * padding - k) // stride + 1
    xp = jnp.pad(x_nhwc, ((0, 0), (padding, padding), (padding, padding), (0, 0)))
    cols = []
    for i in range(k):
        for j in range(k):
            cols.append(xp[:, i:i + stride * hout:stride,
                           j:j + stride * wout:stride, :])    # (N,Hout,Wout,C)
    patches = jnp.stack(cols, axis=-1)                  # (N,Hout,Wout,C,k*k)
    patches = patches.reshape(n, hout, wout, c * k * k)
    if k_padded > c * k * k:
        patches = jnp.pad(
            patches, ((0, 0), (0, 0), (0, 0), (0, k_padded - c * k * k)))
    return patches, hout, wout


def conv2d_pallas(x_nhwc, w2d, b2d, *, kernel_size, stride, padding,
                  apply_relu, out_dtype):
    """One Conv2d (+ optional fused ReLU).
    x_nhwc: bf16 (N,H,W,Cin_eff); w2d: bf16 (Kp, Cp) prepared weight;
    b2d: f32 (1, Cp).  Returns NHWC with Cp (lane-padded) channels."""
    n = x_nhwc.shape[0]
    kp, cp = w2d.shape
    patches, hout, wout = _im2col_nhwc(x_nhwc, kernel_size, stride, padding, kp)

    m = n * hout * wout
    x2d = patches.reshape(m, kp)

    out_itemsize = jnp.dtype(out_dtype).itemsize
    tm = _pick_tile_m(m, kp, cp, out_itemsize)
    mp = _round_up(m, tm)
    if mp > m:
        x2d = jnp.pad(x2d, ((0, mp - m), (0, 0)))

    out2d = pl.pallas_call(
        functools.partial(_matmul_bias_act_kernel, apply_relu=apply_relu),
        out_shape=jax.ShapeDtypeStruct((mp, cp), out_dtype),
        grid=(mp // tm,),
        in_specs=[
            pl.BlockSpec((tm, kp), lambda i: (i, 0)),   # activations: tiled M
            pl.BlockSpec((kp, cp), lambda i: (0, 0)),   # weight: grid-invariant
            pl.BlockSpec((1, cp), lambda i: (0, 0)),    # bias
        ],
        out_specs=pl.BlockSpec((tm, cp), lambda i: (i, 0)),
        compiler_params=pltpu.CompilerParams(
            dimension_semantics=("parallel",),          # megacore-shardable M
            vmem_limit_bytes=VMEM_LIMIT),
    )(x2d, w2d, b2d)

    return out2d[:m].reshape(n, hout, wout, cp)


def _prepare_conv_params(w_oihw, bias, *, cin_in_data, cout_padded):
    """Pad/transpose/cast one conv's weights once, outside the forward pass.
    Returns (w2d bf16 (Kp, Cp), b2d f32 (1, Cp))."""
    cout, cin, kh, kw = w_oihw.shape
    w = jnp.zeros((cout_padded, cin_in_data, kh, kw), jnp.float32)
    w = w.at[:cout, :cin].set(w_oihw.astype(jnp.float32))
    kdim = cin_in_data * kh * kw
    kp = _round_up(kdim, SUBLANE)
    w2d = w.reshape(cout_padded, kdim).T                        # (K, Cp)
    w2d = jnp.pad(w2d, ((0, kp - kdim), (0, 0))).astype(jnp.bfloat16)
    b2d = jnp.zeros((1, cout_padded), jnp.float32)
    b2d = b2d.at[0, :cout].set(bias.astype(jnp.float32))
    return w2d, b2d


def prepare_params(params, *, in_channel, out_channel):
    """One-time weight prep: pad Cout to a lane-dense multiple of 128,
    transpose to (K, Cout_pad), cast to bf16.  conv2's input-channel dim is
    built against conv1's *padded* output so the padded activation can be
    consumed directly (the extra weight rows are zero)."""
    cp = _round_up(out_channel, LANE)
    w1, b1 = _prepare_conv_params(params["w1"], params["b1"],
                                  cin_in_data=in_channel, cout_padded=cp)
    w2, b2 = _prepare_conv_params(params["w2"], params["b2"],
                                  cin_in_data=cp, cout_padded=cp)
    return {"w1": w1, "b1": b1, "w2": w2, "b2": b2}


def basic_conv_block(x_nchw, prepared, *, out_channel, kernel_size, stride,
                     padding):
    """Forward of BasicConvBlock: Conv2d(stride) -> ReLU -> Conv2d(stride=1)."""
    x_nhwc = jnp.transpose(x_nchw, (0, 2, 3, 1)).astype(jnp.bfloat16)
    h = conv2d_pallas(x_nhwc, prepared["w1"], prepared["b1"],
                      kernel_size=kernel_size, stride=stride, padding=padding,
                      apply_relu=True, out_dtype=jnp.bfloat16)
    # h has lane-padded channels; pad channels are exactly 0 (zero bias, ReLU),
    # so conv2 consumes it directly -- no slice / layout round-trip in between.
    y = conv2d_pallas(h, prepared["w2"], prepared["b2"],
                      kernel_size=kernel_size, stride=1, padding=padding,
                      apply_relu=False, out_dtype=jnp.float32)
    y = y[..., :out_channel]
    return jnp.transpose(y, (0, 3, 1, 2))               # back to NCHW


def _reference_forward_f32(x_nchw, params, *, stride, padding):
    """Pure-JAX float32 reference (lax conv)."""
    dn = ("NCHW", "OIHW", "NCHW")
    h = lax.conv_general_dilated(x_nchw, params["w1"], (stride, stride),
                                 [(padding, padding)] * 2, dimension_numbers=dn)
    h = jnp.maximum(h + params["b1"][None, :, None, None], 0.0)
    y = lax.conv_general_dilated(h, params["w2"], (1, 1),
                                 [(padding, padding)] * 2, dimension_numbers=dn)
    return y + params["b2"][None, :, None, None]


def _reference_forward_bf16(x_nchw, params, *, stride, padding):
    """Reference applying the same bf16-in / f32-accumulate casts as the
    Pallas pipeline (apples-to-apples numerical check)."""
    dn = ("NCHW", "OIHW", "NCHW")
    xb = x_nchw.astype(jnp.bfloat16)
    w1 = params["w1"].astype(jnp.bfloat16)
    w2 = params["w2"].astype(jnp.bfloat16)
    h = lax.conv_general_dilated(xb, w1, (stride, stride),
                                 [(padding, padding)] * 2, dimension_numbers=dn,
                                 preferred_element_type=jnp.float32)
    h = jnp.maximum(h + params["b1"][None, :, None, None], 0.0)
    h = h.astype(jnp.bfloat16)
    y = lax.conv_general_dilated(h, w2, (1, 1),
                                 [(padding, padding)] * 2, dimension_numbers=dn,
                                 preferred_element_type=jnp.float32)
    return y + params["b2"][None, :, None, None]


def init_params(key, in_channel, out_channel, kernel_size):
    k1, k2, k3, k4 = jax.random.split(key, 4)
    scale1 = 1.0 / (in_channel * kernel_size * kernel_size) ** 0.5
    scale2 = 1.0 / (out_channel * kernel_size * kernel_size) ** 0.5
    return {
        "w1": scale1 * jax.random.normal(
            k1, (out_channel, in_channel, kernel_size, kernel_size), jnp.float32),
        "b1": scale1 * jax.random.normal(k2, (out_channel,), jnp.float32),
        "w2": scale2 * jax.random.normal(
            k3, (out_channel, out_channel, kernel_size, kernel_size), jnp.float32),
        "b2": scale2 * jax.random.normal(k4, (out_channel,), jnp.float32),
    }


if __name__ == "__main__":
    # Small shapes consistent with the module's forward.
    batch, in_channel, out_channel = 2, 4, 8
    height = width = 16
    kernel_size, stride, padding = 3, 2, 1

    key = jax.random.PRNGKey(0)
    kx, kparams = jax.random.split(key)
    x = jax.random.normal(kx, (batch, in_channel, height, width), jnp.float32)
    params = init_params(kparams, in_channel, out_channel, kernel_size)

    prepared = prepare_params(params, in_channel=in_channel,
                              out_channel=out_channel)

    fwd = jax.jit(functools.partial(
        basic_conv_block, out_channel=out_channel, kernel_size=kernel_size,
        stride=stride, padding=padding))
    out = jax.block_until_ready(fwd(x, prepared))

    ref32 = _reference_forward_f32(x, params, stride=stride, padding=padding)
    refbf = _reference_forward_bf16(x, params, stride=stride, padding=padding)

    assert out.shape == ref32.shape, (out.shape, ref32.shape)
    assert jnp.allclose(out, refbf, atol=5e-3, rtol=5e-3), \
        "mismatch vs bf16-matched reference"
    assert jnp.allclose(out, ref32, atol=5e-2, rtol=5e-2), \
        "mismatch vs float32 reference"

    print("KERNEL_OK")
</pallas_src>

<mosaic_0001>
module attributes {stable_mosaic.version = 11 : i64} {
  func.func @_matmul_bias_act_kernel(%arg0: i32, %arg1: memref<128x40xbf16, #tpu.memory_space<vmem>>, %arg2: memref<40x128xbf16, #tpu.memory_space<vmem>>, %arg3: memref<1x128xf32, #tpu.memory_space<vmem>>, %arg4: memref<128x128xbf16, #tpu.memory_space<vmem>>) attributes {dimension_semantics = [#tpu.dimension_semantics<parallel>], iteration_bounds = array<i64: 1>, scalar_prefetch = 0 : i64, scratch_operands = 0 : i64, tpu.core_type = #tpu.core_type<tc>, window_params = [{transform_indices = @transform_0, window_bounds = array<i64: 128, 40>}, {pipeline_mode = #tpu.pipeline_mode<synchronous>, transform_indices = @transform_1, window_bounds = array<i64: 40, 128>}, {pipeline_mode = #tpu.pipeline_mode<synchronous>, transform_indices = @transform_2, window_bounds = array<i64: 1, 128>}, {transform_indices = @transform_3, window_bounds = array<i64: 128, 128>}]} {
    %c0 = arith.constant 0 : index
    %c0_0 = arith.constant 0 : index
    %0 = vector.load %arg1[%c0, %c0_0] : memref<128x40xbf16, #tpu.memory_space<vmem>>, vector<128x40xbf16>
    %c0_1 = arith.constant 0 : index
    %c0_2 = arith.constant 0 : index
    %1 = vector.load %arg2[%c0_1, %c0_2] : memref<40x128xbf16, #tpu.memory_space<vmem>>, vector<40x128xbf16>
    %cst = arith.constant dense<0.000000e+00> : vector<128x128xf32>
    %2 = tpu.matmul %0, %1, %cst {dimension_numbers = #tpu.dot_dimension_numbers<[1], [0], [0], [1], [0, 0, 1, 1], [], []>} : vector<128x40xbf16>, vector<40x128xbf16>, vector<128x128xf32> -> vector<128x128xf32>
    %c0_3 = arith.constant 0 : index
    %c0_4 = arith.constant 0 : index
    %3 = vector.load %arg3[%c0_3, %c0_4] : memref<1x128xf32, #tpu.memory_space<vmem>>, vector<1x128xf32>
    %4 = vector.broadcast %3 : vector<1x128xf32> to vector<128x128xf32>
    %5 = arith.addf %2, %4 : vector<128x128xf32>
    %cst_5 = arith.constant 0.000000e+00 : f32
    %6 = vector.broadcast %cst_5 : f32 to vector<128x128xf32>
    %7 = arith.maximumf %5, %6 : vector<128x128xf32>
    %8 = arith.truncf %7 : vector<128x128xf32> to vector<128x128xbf16>
    %c0_6 = arith.constant 0 : index
    %c0_7 = arith.constant 0 : index
    %9 = vector.load %arg4[%c0_6, %c0_7] : memref<128x128xbf16, #tpu.memory_space<vmem>>, vector<128x128xbf16>
    tpu.vector_store %arg4[%c0_6, %c0_7], %8 {strides = array<i32>} : memref<128x128xbf16, #tpu.memory_space<vmem>>, vector<128x128xbf16>,
    return
  }
  func.func @transform_0(%arg0: i32) -> (i32, i32) {
    %c0_i32 = arith.constant 0 : i32
    %c0_i32_0 = arith.constant 0 : i32
    return %arg0, %c0_i32 : i32, i32
  }
  func.func @transform_1(%arg0: i32) -> (i32, i32) {
    %c0_i32 = arith.constant 0 : i32
    %c0_i32_0 = arith.constant 0 : i32
    %c0_i32_1 = arith.constant 0 : i32
    return %c0_i32, %c0_i32_0 : i32, i32
  }
  func.func @transform_2(%arg0: i32) -> (i32, i32) {
    %c0_i32 = arith.constant 0 : i32
    %c0_i32_0 = arith.constant 0 : i32
    %c0_i32_1 = arith.constant 0 : i32
    return %c0_i32, %c0_i32_0 : i32, i32
  }
  func.func @transform_3(%arg0: i32) -> (i32, i32) {
    %c0_i32 = arith.constant 0 : i32
    %c0_i32_0 = arith.constant 0 : i32
    return %arg0, %c0_i32 : i32, i32
  }
}

module attributes {stable_mosaic.version = 11 : i64} {
  func.func @_matmul_bias_act_kernel(%arg0: i32, %arg1: memref<128x1152xbf16, #tpu.memory_space<vmem>>, %arg2: memref<1152x128xbf16, #tpu.memory_space<vmem>>, %arg3: memref<1x128xf32, #tpu.memory_space<vmem>>, %arg4: memref<128x128xf32, #tpu.memory_space<vmem>>) attributes {dimension_semantics = [#tpu.dimension_semantics<parallel>], iteration_bounds = array<i64: 1>, scalar_prefetch = 0 : i64, scratch_operands = 0 : i64, tpu.core_type = #tpu.core_type<tc>, window_params = [{transform_indices = @transform_0, window_bounds = array<i64: 128, 1152>}, {pipeline_mode = #tpu.pipeline_mode<synchronous>, transform_indices = @transform_1, window_bounds = array<i64: 1152, 128>}, {pipeline_mode = #tpu.pipeline_mode<synchronous>, transform_indices = @transform_2, window_bounds = array<i64: 1, 128>}, {transform_indices = @transform_3, window_bounds = array<i64: 128, 128>}]} {
    %c0 = arith.constant 0 : index
    %c0_0 = arith.constant 0 : index
    %0 = vector.load %arg1[%c0, %c0_0] : memref<128x1152xbf16, #tpu.memory_space<vmem>>, vector<128x1152xbf16>
    %c0_1 = arith.constant 0 : index
    %c0_2 = arith.constant 0 : index
    %1 = vector.load %arg2[%c0_1, %c0_2] : memref<1152x128xbf16, #tpu.memory_space<vmem>>, vector<1152x128xbf16>
    %cst = arith.constant dense<0.000000e+00> : vector<128x128xf32>
    %2 = tpu.matmul %0, %1, %cst {dimension_numbers = #tpu.dot_dimension_numbers<[1], [0], [0], [1], [0, 0, 1, 1], [], []>} : vector<128x1152xbf16>, vector<1152x128xbf16>, vector<128x128xf32> -> vector<128x128xf32>
    %c0_3 = arith.constant 0 : index
    %c0_4 = arith.constant 0 : index
    %3 = vector.load %arg3[%c0_3, %c0_4] : memref<1x128xf32, #tpu.memory_space<vmem>>, vector<1x128xf32>
    %4 = vector.broadcast %3 : vector<1x128xf32> to vector<128x128xf32>
    %5 = arith.addf %2, %4 : vector<128x128xf32>
    %c0_5 = arith.constant 0 : index
    %c0_6 = arith.constant 0 : index
    %6 = vector.load %arg4[%c0_5, %c0_6] : memref<128x128xf32, #tpu.memory_space<vmem>>, vector<128x128xf32>
    tpu.vector_store %arg4[%c0_5, %c0_6], %5 {strides = array<i32>} : memref<128x128xf32, #tpu.memory_space<vmem>>, vector<128x128xf32>,
    return
  }
  func.func @transform_0(%arg0: i32) -> (i32, i32) {
    %c0_i32 = arith.constant 0 : i32
    %c0_i32_0 = arith.constant 0 : i32
    return %arg0, %c0_i32 : i32, i32
  }
  func.func @transform_1(%arg0: i32) -> (i32, i32) {
    %c0_i32 = arith.constant 0 : i32
    %c0_i32_0 = arith.constant 0 : i32
    %c0_i32_1 = arith.constant 0 : i32
    return %c0_i32, %c0_i32_0 : i32, i32
  }
  func.func @transform_2(%arg0: i32) -> (i32, i32) {
    %c0_i32 = arith.constant 0 : i32
    %c0_i32_0 = arith.constant 0 : i32
    %c0_i32_1 = arith.constant 0 : i32
    return %c0_i32, %c0_i32_0 : i32, i32
  }
  func.func @transform_3(%arg0: i32) -> (i32, i32) {
    %c0_i32 = arith.constant 0 : i32
    %c0_i32_0 = arith.constant 0 : i32
    return %arg0, %c0_i32 : i32, i32
  }
}

</mosaic_0001>

<bundles_post_ra>
// kernel: basic_conv_block.2
= control target key start
LH: loop header
LB: loop body
LE: loop exit
PB: predicated region body
PF: predicated region fallthrough
CT: control target
= control target key end

     0   :  { %8 = vsyncpa [#allocation3], 0  ;;  %s659_s0 = inlined_call_operand.vmem [shape: bf16[128,40], index: 0, kind: input, shape index: {}]   ;;  %s660_s1 = inlined_call_operand.hbm [shape: bf16[40,128], index: 1, kind: input, shape index: {}]   ;;  %s661_s2 = inlined_call_operand.hbm [shape: f32[1,128], index: 2, kind: input, shape index: {}]   ;;  %s662_s3 = inlined_call_operand.vmem [shape: bf16[128,128], index: 3, kind: output, shape index: {}]  }
   0x1   :  { %9 = vsyncpa [#allocation5], 0  ;;  %s555_s12 = smov [#allocation2]   ;;  %s507_s16 = scalar_lea.hbm %s660_s1, 320 }
   0x2   :  { %s17_s13 = sshll.u32 %s555_s12, 4  ;;  %p508_p0 = scmp.ne.s32.totalorder %s660_s1, %s507_s16  ;;  %s18_s13 = int_to_ptr.vmem [resolvable:$true] %s17_s13 }
   0x3   :  { %p511_p1 = scmp.lt.u32.totalorder %s507_s16, %s660_s1 }
   0x5   :  { %p513_p2 = pnand %p511_p1, %p508_p0 }
   0x7   :  { %516 = shalt.err (!%p513_p2)
}
   0x8   :  { %s517_s21 = scalar_lea.vmem %s18_s13, 320  ;;  %p522_p4 = scmp.lt.s32.totalorder %s18_s13, %s18_s13 }
   0x9   :  { %p518_p3 = scmp.ne.s32.totalorder %s18_s13, %s517_s21  ;;  %p523_p5 = scmp.lt.s32.totalorder %s517_s21, %s517_s21 }
   0xb   :  { %p524_p6 = por %p523_p5, %p522_p4 }
   0xd   :  { %p525_p7 = pnand %p524_p6, %p518_p3 }
   0xf   :  { %528 = shalt.err (!%p525_p7)
}
  0x10   :  { %s556_s22 = smov 64   ;;  %s557_s23 = smov 4  }
  0x11   :  { %23 = dma.hbm_to_vmem [thread:$0]  %s660_s1, 320, %s18_s13, [#allocation3], %s556_s22, %s556_s22, %s557_s23  }
  0x12   :  { %s558_s26 = smov [#allocation4]   ;;  %s529_s30 = scalar_lea.hbm %s661_s2, 16 }
  0x13   :  { %s30_s27 = sshll.u32 %s558_s26, 4  ;;  %p530_p8 = scmp.ne.s32.totalorder %s661_s2, %s529_s30  ;;  %s31_s27 = int_to_ptr.vmem [resolvable:$true] %s30_s27 }
  0x14   :  { %p533_p9 = scmp.lt.u32.totalorder %s529_s30, %s661_s2 }
  0x16   :  { %p535_p10 = pnand %p533_p9, %p530_p8 }
  0x18   :  { %538 = shalt.err (!%p535_p10)
}
  0x19   :  { %s539_s8 = scalar_lea.vmem %s31_s27, 16  ;;  %s543_s1 = scalar_lea.vmem %s31_s27, 32 }
  0x1a   :  { %p540_p11 = scmp.ne.s32.totalorder %s31_s27, %s539_s8  ;;  %p544_p12 = scmp.lt.s32.totalorder %s31_s27, %s31_s27 }
  0x1b   :  { %p545_p13 = scmp.lt.s32.totalorder %s543_s1, %s539_s8 }
  0x1d   :  { %p546_p0 = por %p545_p13, %p544_p12 }
  0x1f   :  { %p547_p1 = pnand %p546_p0, %p540_p11 }
  0x21   :  { %550 = shalt.err (!%p547_p1)
}
  0x22   :  { %33 = dma.hbm_to_vmem [thread:$0]  %s661_s2, 16, %s31_s27, [#allocation5]  }
  0x23   :  { %551 = dma.done.wait [#allocation3], 320  }
  0x24   :  { %552 = vsyncadd [#allocation3], 4294966976 }
  0x25   :  { %553 = dma.done.wait [#allocation5], 16  }
  0x26   :  { %554 = vsyncadd [#allocation5], 4294967280  ;;  %v496_v0 = vld [vmem:[#allocation2] sm:$0xff]   ;;  %v497_v1 = vld [vmem:[#allocation2 + $0x8] sm:$0xff]   ;;  %vm124_vm0 = vcmask 326656   ;;  %vm149_vm1 = vcmask 1043456  }
  0x27   :  { %462 = vmatprep.subr.bf16.mxu0 %v496_v0  ;;  %484 = vmatprep.subr.bf16.mxu1 %v496_v0  ;;  %v498_v2 = vld [vmem:[#allocation2 + $0x10] ss:$0 sps:$4 sm:$0xff]   ;;  %v499_v3 = vld [vmem:[%s659_s0] sm:$0xff]   ;;  %v501_v6 = vld [vmem:[%s659_s0 + $0x8] sm:$0xff]  }
  0x28   :  { %463 = vmatpush3.bf16.msra.mxu0 %v496_v0  ;;  %487 = vmatpush3.bf16.msra.mxu1 %v496_v0  ;;  %v500_v4 = vld [vmem:[%s659_s0 + $0x20] sm:$0xff]   ;;  %v151_v5 = vsel %vm149_vm1, %v498_v2, 0  ;;  %v502_v7 = vld [vmem:[%s659_s0 + $0x28] sm:$0xff]   ;;  %v503_v8 = vld [vmem:[%s659_s0 + $0x10] sm:$0xff]  }
  0x29   :  { %464 = vmatprep.subr.bf16.mxu0 %v497_v1  ;;  %485 = vmatprep.subr.bf16.mxu1 %v497_v1  ;;  %v504_v9 = vld [vmem:[%s659_s0 + $0x30] sm:$0xff]   ;;  %v505_v10 = vld [vmem:[%s659_s0 + $0x18] sm:$0xff]  }
  0x2a   :  { %468 = vmatprep.mubr.msk.bf16.mxu0 %vm124_vm0, %v499_v3  ;;  %476 = vmatprep.mubr.msk.bf16.mxu1 %vm124_vm0, %v500_v4  ;;  %v506_v11 = vld [vmem:[%s659_s0 + $0x38] sm:$0xff]   ;;  %v352_v12 = vld [vmem:[#allocation4] ss:$0 sm:$0xff] }
  0x2c   :  { %465 = vmatpush3.bf16.msra.mxu0 %v497_v1  ;;  %488 = vmatpush3.bf16.msra.mxu1 %v497_v1 }
  0x2d   :  { %490 = vmatprep.subr.msk.bf16.mxu0 %vm149_vm1, %v498_v2  ;;  %491 = vmatprep.subr.msk.bf16.mxu1 %vm149_vm1, %v498_v2 }
  0x30   :  { %467 = vmatpush3.bf16.msra.mxu0 %v151_v5  ;;  %489 = vmatpush3.bf16.msra.mxu1 %v151_v5 }
  0x33   :  { %469 = vmatmul.mubr.msk.bf16.vlgmr.msra.gmra.mrb[0].mxu0 %vm124_vm0, %v501_v6  ;;  %477 = vmatmul.mubr.msk.bf16.vlgmr.msra.gmra.mrb[0].mxu1 %vm124_vm0, %v502_v7 }
  0x34   :  { %472 = vmatprep.mubr.msk.bf16.mxu0 %vm124_vm0, %v503_v8  ;;  %480 = vmatprep.mubr.msk.bf16.mxu1 %vm124_vm0, %v504_v9 }
  0x3b   :  { %473 = vmatmul.mubr.msk.bf16.gmra.mrb[4].mxu0 %vm124_vm0, %v505_v10  ;;  %481 = vmatmul.mubr.msk.bf16.gmra.mrb[4].mxu1 %vm124_vm0, %v506_v11 }
 0x106   :  { %v470_v13 = vpop.f32.mrb[0].mxu0  ;;  %v478_v14 = vpop.f32.mrb[0].mxu1 }
 0x107   :  { %v196_v15 = vadd.f32 %v470_v13, %v352_v12  ;;  %v228_v16 = vadd.f32 %v478_v14, %v352_v12  ;;  %v187_v17 = vpop.f32.mrb[1].mxu0  ;;  %v219_v18 = vpop.f32.mrb[1].mxu1 }
 0x108   :  { %v188_v19 = vadd.f32 %v352_v12, %v187_v17  ;;  %v220_v20 = vadd.f32 %v352_v12, %v219_v18  ;;  %v471_v21 = vpop.f32.mrb[2].mxu0  ;;  %v479_v22 = vpop.f32.mrb[2].mxu1 }
 0x109   :  { %v199_v23 = vadd.f32 %v471_v21, %v352_v12  ;;  %v231_v24 = vadd.f32 %v479_v22, %v352_v12  ;;  %v190_v25 = vpop.f32.mrb[3].mxu0  ;;  %v222_v26 = vpop.f32.mrb[3].mxu1  ;;  %v252_v29 = vmax.f32 %v196_v15, 0.0  ;;  %v260_v30 = vmax.f32 %v228_v16, 0.0 }
 0x10a   :  { %v191_v27 = vadd.f32 %v352_v12, %v190_v25  ;;  %v223_v28 = vadd.f32 %v352_v12, %v222_v26  ;;  %v250_v33 = vmax.f32 %v188_v19, 0.0  ;;  %v258_v34 = vmax.f32 %v220_v20, 0.0 }
 0x10b   :  { %v253_v31 = vmax.f32 %v199_v23, 0.0  ;;  %v261_v32 = vmax.f32 %v231_v24, 0.0 }
 0x10c   :  { %v251_v35 = vmax.f32 %v191_v27, 0.0  ;;  %v259_v36 = vmax.f32 %v223_v28, 0.0 }
 0x10d   :  { %v412_v37 = vpack.c.bf16 %v253_v31, %v252_v29  ;;  %v432_v38 = vpack.c.bf16 %v261_v32, %v260_v30 }
 0x10e   :  { %v407_v39 = vpack.c.bf16 %v251_v35, %v250_v33  ;;  %v427_v40 = vpack.c.bf16 %v259_v36, %v258_v34  ;;  %v474_v41 = vpop.f32.mrb[4].mxu0  ;;  %v482_v42 = vpop.f32.mrb[4].mxu1 }
 0x10f   :  { %444 = vst [vmem:[%s662_s3 + $0x8] sm:$0xff] %v412_v37   ;;  %448 = vst [vmem:[%s662_s3 + $0x28] sm:$0xff] %v432_v38   ;;  %v212_v43 = vadd.f32 %v474_v41, %v352_v12  ;;  %v244_v44 = vadd.f32 %v482_v42, %v352_v12  ;;  %v203_v45 = vpop.f32.mrb[5].mxu0  ;;  %v235_v46 = vpop.f32.mrb[5].mxu1 }
 0x110   :  { %408 = vst [vmem:[%s662_s3] sm:$0xff] %v407_v39   ;;  %447 = vst [vmem:[%s662_s3 + $0x20] sm:$0xff] %v427_v40   ;;  %v204_v47 = vadd.f32 %v352_v12, %v203_v45  ;;  %v236_v48 = vadd.f32 %v352_v12, %v235_v46  ;;  %v475_v49 = vpop.f32.mrb[6].mxu0  ;;  %v483_v50 = vpop.f32.mrb[6].mxu1 }
 0x111   :  { %v215_v51 = vadd.f32 %v475_v49, %v352_v12  ;;  %v247_v52 = vadd.f32 %v483_v50, %v352_v12  ;;  %v206_v53 = vpop.f32.mrb[7].mxu0  ;;  %v238_v54 = vpop.f32.mrb[7].mxu1  ;;  %v256_v57 = vmax.f32 %v212_v43, 0.0  ;;  %v264_v58 = vmax.f32 %v244_v44, 0.0 }
 0x112   :  { %v207_v55 = vadd.f32 %v352_v12, %v206_v53  ;;  %v239_v56 = vadd.f32 %v352_v12, %v238_v54  ;;  %v254_v61 = vmax.f32 %v204_v47, 0.0  ;;  %v262_v62 = vmax.f32 %v236_v48, 0.0 }
 0x113   :  { %v257_v59 = vmax.f32 %v215_v51, 0.0  ;;  %v265_v60 = vmax.f32 %v247_v52, 0.0 }
 0x114   :  { %v255_v63 = vmax.f32 %v207_v55, 0.0  ;;  %v263_v0 = vmax.f32 %v239_v56, 0.0 }
 0x115   :  { %v422_v1 = vpack.c.bf16 %v257_v59, %v256_v57  ;;  %v442_v2 = vpack.c.bf16 %v265_v60, %v264_v58 }
 0x116   :  { %v417_v3 = vpack.c.bf16 %v255_v63, %v254_v61  ;;  %v437_v4 = vpack.c.bf16 %v263_v0, %v262_v62 }
 0x117   :  { %446 = vst [vmem:[%s662_s3 + $0x18] sm:$0xff] %v422_v1   ;;  %450 = vst [vmem:[%s662_s3 + $0x38] sm:$0xff] %v442_v2  }
 0x118   :  { %445 = vst [vmem:[%s662_s3 + $0x10] sm:$0xff] %v417_v3   ;;  %449 = vst [vmem:[%s662_s3 + $0x30] sm:$0xff] %v437_v4  }
 0x119   :  { %350 = vsyncpa [#allocation3], 1 }
 0x11a   :  { %351 = vsyncpa [#allocation5], 1 }

// kernel: basic_conv_block.3
= control target key start
LH: loop header
LB: loop body
LE: loop exit
PB: predicated region body
PF: predicated region fallthrough
CT: control target
= control target key end

     0   :  { %s2788_s1 = inlined_call_operand.vmem [shape: bf16[1152,128], index: 1, kind: input, shape index: {}]   ;;  %s2789_s0 = inlined_call_operand.vmem [shape: bf16[128,1152], index: 0, kind: input, shape index: {}]   ;;  %s2790_s2 = inlined_call_operand.vmem [shape: f32[1,128], index: 2, kind: input, shape index: {}]   ;;  %s2791_s3 = inlined_call_operand.vmem [shape: f32[128,128], index: 3, kind: output, shape index: {}]  }
   0x1   :  { %v2016_v0 = vld [vmem:[%s2788_s1 + $0x40] sm:$0xff]   ;;  %v2020_v4 = vld [vmem:[%s2788_s1 + $0x48] sm:$0xff]   ;;  %v2024_v8 = vld [vmem:[%s2788_s1 + $0x50] sm:$0xff]  }
   0x2   :  { %v2017_v1 = vld [vmem:[%s2788_s1 + $0xc0] sm:$0xff]   ;;  %1696 = vmatprep.subr.bf16.mxu0 %v2016_v0  ;;  %v2021_v5 = vld [vmem:[%s2788_s1 + $0xc8] sm:$0xff]   ;;  %v2025_v9 = vld [vmem:[%s2788_s1 + $0xd0] sm:$0xff]  }
   0x3   :  { %v2018_v2 = vld [vmem:[%s2788_s1] sm:$0xff]   ;;  %1760 = vmatprep.subr.bf16.mxu1 %v2017_v1  ;;  %v2022_v6 = vld [vmem:[%s2788_s1 + $0x8] sm:$0xff]   ;;  %v2026_v10 = vld [vmem:[%s2788_s1 + $0x10] sm:$0xff]  }
   0x4   :  { %v2019_v3 = vld [vmem:[%s2788_s1 + $0x80] sm:$0xff]   ;;  %1697 = vmatpush3.bf16.msra.mxu0 %v2018_v2  ;;  %v2023_v7 = vld [vmem:[%s2788_s1 + $0x88] sm:$0xff]   ;;  %v2027_v11 = vld [vmem:[%s2788_s1 + $0x90] sm:$0xff]  }
   0x5   :  { %1761 = vmatpush3.bf16.msra.mxu1 %v2019_v3  ;;  %1698 = vmatprep.subr.bf16.mxu0 %v2020_v4  ;;  %v2028_v12 = vld [vmem:[%s2788_s1 + $0x58] sm:$0xff]   ;;  %v2032_v16 = vld [vmem:[%s2788_s1 + $0x60] sm:$0xff]   ;;  %v2036_v20 = vld [vmem:[%s2788_s1 + $0x68] sm:$0xff]  }
   0x6   :  { %1762 = vmatprep.subr.bf16.mxu1 %v2021_v5  ;;  %v2029_v13 = vld [vmem:[%s2788_s1 + $0xd8] sm:$0xff]   ;;  %v2033_v17 = vld [vmem:[%s2788_s1 + $0xe0] sm:$0xff]   ;;  %v2037_v21 = vld [vmem:[%s2788_s1 + $0xe8] sm:$0xff]  }
   0x7   :  { %v2030_v14 = vld [vmem:[%s2788_s1 + $0x18] sm:$0xff]   ;;  %v2034_v18 = vld [vmem:[%s2788_s1 + $0x20] sm:$0xff]   ;;  %v2038_v22 = vld [vmem:[%s2788_s1 + $0x28] sm:$0xff]  }
   0x8   :  { %1699 = vmatpush3.bf16.msra.mxu0 %v2022_v6  ;;  %v2031_v15 = vld [vmem:[%s2788_s1 + $0x98] sm:$0xff]   ;;  %v2035_v19 = vld [vmem:[%s2788_s1 + $0xa0] sm:$0xff]   ;;  %v2039_v23 = vld [vmem:[%s2788_s1 + $0xa8] sm:$0xff]  }
   0x9   :  { %1763 = vmatpush3.bf16.msra.mxu1 %v2023_v7  ;;  %1700 = vmatprep.subr.bf16.mxu0 %v2024_v8  ;;  %v2040_v24 = vld [vmem:[%s2788_s1 + $0x70] sm:$0xff]   ;;  %v2044_v28 = vld [vmem:[%s2788_s1 + $0x78] sm:$0xff]   ;;  %v2048_v32 = vld [vmem:[%s2789_s0] ss:$36 sps:$4 sm:$0xff]  }
   0xa   :  { %1764 = vmatprep.subr.bf16.mxu1 %v2025_v9  ;;  %v2041_v25 = vld [vmem:[%s2788_s1 + $0xf0] sm:$0xff]   ;;  %v2045_v29 = vld [vmem:[%s2788_s1 + $0xf8] sm:$0xff]   ;;  %v2050_v33 = vld [vmem:[%s2789_s0 + $0x4] ss:$36 sps:$4 sm:$0xff]  }
   0xb   :  { %v2042_v26 = vld [vmem:[%s2788_s1 + $0x30] sm:$0xff]   ;;  %v2046_v30 = vld [vmem:[%s2788_s1 + $0x38] sm:$0xff]   ;;  %v2051_v34 = vld [vmem:[%s2789_s0 + $0x8] ss:$36 sps:$4 sm:$0xff]   ;;  %1078 = vmatprep.mubr.bf16.mxu0 %v2050_v33 }
   0xc   :  { %1701 = vmatpush3.bf16.msra.mxu0 %v2026_v10  ;;  %v2043_v27 = vld [vmem:[%s2788_s1 + $0xb0] sm:$0xff]   ;;  %v2047_v31 = vld [vmem:[%s2788_s1 + $0xb8] sm:$0xff]   ;;  %v2054_v36 = vld [vmem:[%s2788_s1 + $0x140] sm:$0xff]  }
   0xd   :  { %1765 = vmatpush3.bf16.msra.mxu1 %v2027_v11  ;;  %1702 = vmatprep.subr.bf16.mxu0 %v2028_v12  ;;  %v2053_v35 = vld [vmem:[%s2789_s0 + $0xc] ss:$36 sps:$4 sm:$0xff]   ;;  %v2055_v37 = vld [vmem:[%s2788_s1 + $0x1c0] sm:$0xff]   ;;  %v2060_v41 = vld [vmem:[%s2789_s0 + $0x54] ss:$36 sps:$4 sm:$0xff]  }
   0xe   :  { %1766 = vmatprep.subr.bf16.mxu1 %v2029_v13  ;;  %1175 = vmatprep.mubr.bf16.mxu1 %v2053_v35  ;;  %v2056_v38 = vld [vmem:[%s2788_s1 + $0x100] sm:$0xff]   ;;  %v2058_v40 = vld [vmem:[%s2789_s0 + $0x4c] ss:$36 sps:$4 sm:$0xff]   ;;  %v2068_v48 = vld [vmem:[%s2789_s0 + $0x94] ss:$36 sps:$4 sm:$0xff]  }
   0xf   :  { %v2057_v39 = vld [vmem:[%s2788_s1 + $0x180] sm:$0xff]   ;;  %v2062_v42 = vld [vmem:[%s2789_s0 + $0x48] ss:$36 sps:$4 sm:$0xff]   ;;  %v2063_v43 = vld [vmem:[%s2789_s0 + $0x50] ss:$36 sps:$4 sm:$0xff]  }
  0x10   :  { %1703 = vmatpush3.bf16.msra.mxu0 %v2030_v14  ;;  %v2064_v44 = vld [vmem:[%s2788_s1 + $0x148] sm:$0xff]   ;;  %v2070_v49 = vld [vmem:[%s2789_s0 + $0x9c] ss:$36 sps:$4 sm:$0xff]   ;;  %v2072_v50 = vld [vmem:[%s2789_s0 + $0x90] ss:$36 sps:$4 sm:$0xff]  }
  0x11   :  { %1767 = vmatpush3.bf16.msra.mxu1 %v2031_v15  ;;  %1704 = vmatprep.subr.bf16.mxu0 %v2032_v16  ;;  %v2065_v45 = vld [vmem:[%s2788_s1 + $0x1c8] sm:$0xff]   ;;  %v2073_v51 = vld [vmem:[%s2789_s0 + $0x98] ss:$36 sps:$4 sm:$0xff]   ;;  %v2074_v52 = vld [vmem:[%s2788_s1 + $0x150] sm:$0xff]  }
  0x12   :  { %1768 = vmatprep.subr.bf16.mxu1 %v2033_v17  ;;  %v2066_v46 = vld [vmem:[%s2788_s1 + $0x108] sm:$0xff]   ;;  %v2075_v53 = vld [vmem:[%s2788_s1 + $0x1d0] sm:$0xff]   ;;  %v2078_v56 = vld [vmem:[%s2789_s0 + $0xdc] ss:$36 sps:$4 sm:$0xff]  }
  0x13   :  { %v2067_v47 = vld [vmem:[%s2788_s1 + $0x188] sm:$0xff]   ;;  %v2076_v54 = vld [vmem:[%s2788_s1 + $0x110] sm:$0xff]   ;;  %v2082_v58 = vld [vmem:[%s2789_s0 + $0xd8] ss:$36 sps:$4 sm:$0xff]  }
  0x14   :  { %1705 = vmatpush3.bf16.msra.mxu0 %v2034_v18  ;;  %v2077_v55 = vld [vmem:[%s2788_s1 + $0x190] sm:$0xff]   ;;  %v2080_v57 = vld [vmem:[%s2789_s0 + $0xe4] ss:$36 sps:$4 sm:$0xff]   ;;  %v2084_v60 = vld [vmem:[%s2788_s1 + $0x158] sm:$0xff]  }
  0x15   :  { %1769 = vmatpush3.bf16.msra.mxu1 %v2035_v19  ;;  %1706 = vmatprep.subr.bf16.mxu0 %v2036_v20  ;;  %v2083_v59 = vld [vmem:[%s2789_s0 + $0xe0] ss:$36 sps:$4 sm:$0xff]   ;;  %v2085_v61 = vld [vmem:[%s2788_s1 + $0x1d8] sm:$0xff]   ;;  %v2090_v1 = vld [vmem:[%s2789_s0 + $0x12c] ss:$36 sps:$4 sm:$0xff]  }
  0x16   :  { %1770 = vmatprep.subr.bf16.mxu1 %v2037_v21  ;;  %v2086_v62 = vld [vmem:[%s2788_s1 + $0x118] sm:$0xff]   ;;  %v2088_v0 = vld [vmem:[%s2789_s0 + $0x124] ss:$36 sps:$4 sm:$0xff]   ;;  %v2098_v8 = vld [vmem:[%s2789_s0 + $0x16c] ss:$36 sps:$4 sm:$0xff]  }
  0x17   :  { %v2087_v63 = vld [vmem:[%s2788_s1 + $0x198] sm:$0xff]   ;;  %v2092_v2 = vld [vmem:[%s2789_s0 + $0x120] ss:$36 sps:$4 sm:$0xff]   ;;  %v2093_v4 = vld [vmem:[%s2789_s0 + $0x128] ss:$36 sps:$4 sm:$0xff]  }
  0x18   :  { %1707 = vmatpush3.bf16.msra.mxu0 %v2038_v22  ;;  %v2094_v3 = vld [vmem:[%s2788_s1 + $0x160] sm:$0xff]   ;;  %v2100_v9 = vld [vmem:[%s2789_s0 + $0x174] ss:$36 sps:$4 sm:$0xff]   ;;  %v2104_v10 = vld [vmem:[%s2788_s1 + $0x168] sm:$0xff]  }
  0x19   :  { %1771 = vmatpush3.bf16.msra.mxu1 %v2039_v23  ;;  %1708 = vmatprep.subr.bf16.mxu0 %v2040_v24  ;;  %v2095_v5 = vld [vmem:[%s2788_s1 + $0x1e0] sm:$0xff]   ;;  %v2105_v11 = vld [vmem:[%s2788_s1 + $0x1e8] sm:$0xff]   ;;  %v2103_v15 = vld [vmem:[%s2789_s0 + $0x170] ss:$36 sps:$4 sm:$0xff]  }
  0x1a   :  { %1772 = vmatprep.subr.bf16.mxu1 %v2041_v25  ;;  %v2096_v6 = vld [vmem:[%s2788_s1 + $0x120] sm:$0xff]   ;;  %v2102_v12 = vld [vmem:[%s2789_s0 + $0x168] ss:$36 sps:$4 sm:$0xff]   ;;  %v2108_v16 = vld [vmem:[%s2789_s0 + $0x1b4] ss:$36 sps:$4 sm:$0xff]  }
  0x1b   :  { %v2097_v7 = vld [vmem:[%s2788_s1 + $0x1a0] sm:$0xff]   ;;  %v2106_v13 = vld [vmem:[%s2788_s1 + $0x128] sm:$0xff]   ;;  %v2114_v18 = vld [vmem:[%s2788_s1 + $0x170] sm:$0xff]  }
  0x1c   :  { %1709 = vmatpush3.bf16.msra.mxu0 %v2042_v26  ;;  %v2107_v14 = vld [vmem:[%s2788_s1 + $0x1a8] sm:$0xff]   ;;  %v2110_v17 = vld [vmem:[%s2789_s0 + $0x1bc] ss:$36 sps:$4 sm:$0xff]   ;;  %v2115_v19 = vld [vmem:[%s2788_s1 + $0x1f0] sm:$0xff]  }
  0x1d   :  { %1773 = vmatpush3.bf16.msra.mxu1 %v2043_v27  ;;  %1710 = vmatprep.subr.bf16.mxu0 %v2044_v28  ;;  %v2116_v20 = vld [vmem:[%s2788_s1 + $0x130] sm:$0xff]   ;;  %v2113_v23 = vld [vmem:[%s2789_s0 + $0x1b8] ss:$36 sps:$4 sm:$0xff]   ;;  %v2120_v25 = vld [vmem:[%s2789_s0 + $0x204] ss:$36 sps:$4 sm:$0xff]  }
  0x1e   :  { %1774 = vmatprep.subr.bf16.mxu1 %v2045_v29  ;;  %v2117_v21 = vld [vmem:[%s2788_s1 + $0x1b0] sm:$0xff]   ;;  %v2118_v24 = vld [vmem:[%s2789_s0 + $0x1fc] ss:$36 sps:$4 sm:$0xff]  }
  0x1f   :  { %v2112_v22 = vld [vmem:[%s2789_s0 + $0x1b0] ss:$36 sps:$4 sm:$0xff]   ;;  %v2124_v26 = vld [vmem:[%s2788_s1 + $0x178] sm:$0xff]  }
  0x20   :  { %1711 = vmatpush3.bf16.msra.mxu0 %v2046_v30  ;;  %v2125_v27 = vld [vmem:[%s2788_s1 + $0x1f8] sm:$0xff]   ;;  %v2128_v35 = vld [vmem:[%s2789_s0 + $0x10] ss:$36 sps:$4 sm:$0xff]  }
  0x21   :  { %1775 = vmatpush3.bf16.msra.mxu1 %v2047_v31  ;;  %1824 = vmatprep.subr.bf16.mxu0 %v2054_v36  ;;  %v2126_v28 = vld [vmem:[%s2788_s1 + $0x138] sm:$0xff]   ;;  %v2123_v31 = vld [vmem:[%s2789_s0 + $0x200] ss:$36 sps:$4 sm:$0xff]  }
  0x22   :  { %1888 = vmatprep.subr.bf16.mxu1 %v2055_v37  ;;  %v2127_v29 = vld [vmem:[%s2788_s1 + $0x1b8] sm:$0xff]  }
  0x23   :  { %1079 = vmatmul.mubr.bf16.vlgmr.msra.gmra.mrb[0].mxu0 %v2048_v32  ;;  %v2122_v30 = vld [vmem:[%s2789_s0 + $0x1f8] ss:$36 sps:$4 sm:$0xff]   ;;  %v2134_v32 = vld [vmem:[%s2788_s1 + $0x200] sm:$0xff]  }
  0x24   :  { %1176 = vmatmul.mubr.bf16.vlgmr.msra.gmra.mrb[0].mxu1 %v2051_v34  ;;  %1825 = vmatpush3.bf16.msra.mxu0 %v2056_v38  ;;  %v2130_v33 = vld [vmem:[%s2789_s0 + $0x14] ss:$36 sps:$4 sm:$0xff]   ;;  %v2133_v34 = vld [vmem:[%s2789_s0 + $0x1c] ss:$36 sps:$4 sm:$0xff]   ;;  %v2137_v38 = vld [vmem:[%s2789_s0 + $0x64] ss:$36 sps:$4 sm:$0xff]  }
  0x25   :  { %1889 = vmatpush3.bf16.msra.mxu1 %v2057_v39  ;;  %1086 = vmatprep.mubr.bf16.mxu0 %v2058_v40  ;;  %v2131_v36 = vld [vmem:[%s2789_s0 + $0x18] ss:$36 sps:$4 sm:$0xff]   ;;  %v2141_v39 = vld [vmem:[%s2788_s1 + $0x208] sm:$0xff]   ;;  %v2148_v40 = vld [vmem:[%s2788_s1 + $0x210] sm:$0xff]  }
  0x26   :  { %1183 = vmatprep.mubr.bf16.mxu1 %v2060_v41  ;;  %1826 = vmatprep.subr.bf16.mxu0 %v2064_v44  ;;  %v2135_v37 = vld [vmem:[%s2789_s0 + $0x5c] ss:$36 sps:$4 sm:$0xff]   ;;  %v2144_v44 = vld [vmem:[%s2789_s0 + $0xac] ss:$36 sps:$4 sm:$0xff]  }
  0x27   :  { %1890 = vmatprep.subr.bf16.mxu1 %v2065_v45  ;;  %v2139_v41 = vld [vmem:[%s2789_s0 + $0x58] ss:$36 sps:$4 sm:$0xff]  }
  0x28   :  { %1827 = vmatpush3.bf16.msra.mxu0 %v2066_v46  ;;  %v2155_v45 = vld [vmem:[%s2788_s1 + $0x218] sm:$0xff]   ;;  %v2162_v46 = vld [vmem:[%s2788_s1 + $0x220] sm:$0xff]  }
  0x29   :  { %1891 = vmatpush3.bf16.msra.mxu1 %v2067_v47  ;;  %1828 = vmatprep.subr.bf16.mxu0 %v2074_v52  ;;  %v2146_v47 = vld [vmem:[%s2789_s0 + $0xa0] ss:$36 sps:$4 sm:$0xff]   ;;  %v2153_v52 = vld [vmem:[%s2789_s0 + $0xe8] ss:$36 sps:$4 sm:$0xff]  }
  0x2a   :  { %1892 = vmatprep.subr.bf16.mxu1 %v2075_v53  ;;  %v2176_v53 = vld [vmem:[%s2788_s1 + $0x230] sm:$0xff]  }
  0x2b   :  { %1087 = vmatmul.mubr.bf16.gmra.mrb[4].mxu0 %v2062_v42  ;;  %v2140_v42 = vld [vmem:[%s2789_s0 + $0x60] ss:$36 sps:$4 sm:$0xff]  }
  0x2c   :  { %1184 = vmatmul.mubr.bf16.gmra.mrb[4].mxu1 %v2063_v43  ;;  %1094 = vmatprep.mubr.bf16.mxu0 %v2068_v48  ;;  %v2142_v43 = vld [vmem:[%s2789_s0 + $0xa4] ss:$36 sps:$4 sm:$0xff]  }
  0x2d   :  { %1191 = vmatprep.mubr.bf16.mxu1 %v2070_v49  ;;  %1829 = vmatpush3.bf16.msra.mxu0 %v2076_v54  ;;  %v2147_v48 = vld [vmem:[%s2789_s0 + $0xa8] ss:$36 sps:$4 sm:$0xff]   ;;  %v2154_v54 = vld [vmem:[%s2789_s0 + $0xf0] ss:$36 sps:$4 sm:$0xff]  }
  0x2e   :  { %1893 = vmatpush3.bf16.msra.mxu1 %v2077_v55  ;;  %1830 = vmatprep.subr.bf16.mxu0 %v2084_v60  ;;  %v2149_v49 = vld [vmem:[%s2789_s0 + $0xec] ss:$36 sps:$4 sm:$0xff]   ;;  %v2156_v55 = vld [vmem:[%s2789_s0 + $0x134] ss:$36 sps:$4 sm:$0xff]   ;;  %v2163_v60 = vld [vmem:[%s2789_s0 + $0x17c] ss:$36 sps:$4 sm:$0xff]  }
  0x2f   :  { %1894 = vmatprep.subr.bf16.mxu1 %v2085_v61  ;;  %v2165_v61 = vld [vmem:[%s2789_s0 + $0x184] ss:$36 sps:$4 sm:$0xff]  }
  0x31   :  { %1831 = vmatpush3.bf16.msra.mxu0 %v2086_v62  ;;  %v2167_v62 = vld [vmem:[%s2789_s0 + $0x178] ss:$36 sps:$4 sm:$0xff]  }
  0x32   :  { %1895 = vmatpush3.bf16.msra.mxu1 %v2087_v63  ;;  %1832 = vmatprep.subr.bf16.mxu0 %v2094_v3  ;;  %v2168_v63 = vld [vmem:[%s2789_s0 + $0x180] ss:$36 sps:$4 sm:$0xff]   ;;  %v2175_v3 = vld [vmem:[%s2789_s0 + $0x1c8] ss:$36 sps:$4 sm:$0xff]  }
  0x33   :  { %1095 = vmatmul.mubr.bf16.gmra.mrb[8].mxu0 %v2072_v50  ;;  %1896 = vmatprep.subr.bf16.mxu1 %v2095_v5  ;;  %v2151_v50 = vld [vmem:[%s2789_s0 + $0xf4] ss:$36 sps:$4 sm:$0xff]  }
  0x34   :  { %1192 = vmatmul.mubr.bf16.gmra.mrb[8].mxu1 %v2073_v51  ;;  %1102 = vmatprep.mubr.bf16.mxu0 %v2078_v56  ;;  %v2169_v51 = vld [vmem:[%s2788_s1 + $0x228] sm:$0xff]   ;;  %v2158_v56 = vld [vmem:[%s2789_s0 + $0x13c] ss:$36 sps:$4 sm:$0xff]   ;;  %v2179_v5 = vld [vmem:[%s2789_s0 + $0x214] ss:$36 sps:$4 sm:$0xff]  }
  0x35   :  { %1199 = vmatprep.mubr.bf16.mxu1 %v2080_v57  ;;  %1833 = vmatpush3.bf16.msra.mxu0 %v2096_v6  ;;  %v2183_v57 = vld [vmem:[%s2788_s1 + $0x238] sm:$0xff]   ;;  %v2181_v6 = vld [vmem:[%s2789_s0 + $0x208] ss:$36 sps:$4 sm:$0xff]  }
  0x36   :  { %1897 = vmatpush3.bf16.msra.mxu1 %v2097_v7  ;;  %1834 = vmatprep.subr.bf16.mxu0 %v2104_v10  ;;  %v2182_v7 = vld [vmem:[%s2789_s0 + $0x210] ss:$36 sps:$4 sm:$0xff]   ;;  %v2186_v10 = vld [vmem:[%s2789_s0 + $0x68] ss:$36 sps:$4 sm:$0xff]  }
  0x37   :  { %1898 = vmatprep.subr.bf16.mxu1 %v2105_v11  ;;  %v2187_v11 = vld [vmem:[%s2789_s0 + $0x188] ss:$36 sps:$4 sm:$0xff]  }
  0x39   :  { %1835 = vmatpush3.bf16.msra.mxu0 %v2106_v13  ;;  %v2189_v13 = vld [vmem:[%s2789_s0 + $0x1d0] ss:$36 sps:$4 sm:$0xff]  }
  0x3a   :  { %1899 = vmatpush3.bf16.msra.mxu1 %v2107_v14  ;;  %1836 = vmatprep.subr.bf16.mxu0 %v2114_v18  ;;  %v2190_v14 = vld [vmem:[%s2789_s0 + $0xf8] ss:$36 sps:$4 sm:$0xff]   ;;  %v2647_v18 = vld [vmem:[%s2790_s2] ss:$0 sm:$0xff] }
  0x3b   :  { %1103 = vmatmul.mubr.bf16.gmra.mrb[12].mxu0 %v2082_v58  ;;  %1900 = vmatprep.subr.bf16.mxu1 %v2115_v19  ;;  %v2160_v58 = vld [vmem:[%s2789_s0 + $0x130] ss:$36 sps:$4 sm:$0xff]  }
  0x3c   :  { %1200 = vmatmul.mubr.bf16.gmra.mrb[12].mxu1 %v2083_v59  ;;  %1110 = vmatprep.mubr.bf16.mxu0 %v2088_v0  ;;  %v2161_v59 = vld [vmem:[%s2789_s0 + $0x138] ss:$36 sps:$4 sm:$0xff]   ;;  %v2170_v0 = vld [vmem:[%s2789_s0 + $0x1c4] ss:$36 sps:$4 sm:$0xff]  }
  0x3d   :  { %1207 = vmatprep.mubr.bf16.mxu1 %v2090_v1  ;;  %1837 = vmatpush3.bf16.msra.mxu0 %v2116_v20  ;;  %v2172_v1 = vld [vmem:[%s2789_s0 + $0x1cc] ss:$36 sps:$4 sm:$0xff]  }
  0x3e   :  { %1901 = vmatpush3.bf16.msra.mxu1 %v2117_v21  ;;  %1838 = vmatprep.subr.bf16.mxu0 %v2124_v26 }
  0x3f   :  { %1902 = vmatprep.subr.bf16.mxu1 %v2125_v27 }
  0x41   :  { %1839 = vmatpush3.bf16.msra.mxu0 %v2126_v28 }
  0x42   :  { %1903 = vmatpush3.bf16.msra.mxu1 %v2127_v29  ;;  %1968 = vmatprep.subr.bf16.mxu0 %v2134_v32 }
  0x43   :  { %1111 = vmatmul.mubr.bf16.gmra.mrb[16].mxu0 %v2092_v2  ;;  %2000 = vmatprep.subr.bf16.mxu1 %v2134_v32  ;;  %v2174_v2 = vld [vmem:[%s2789_s0 + $0x1c0] ss:$36 sps:$4 sm:$0xff]  }
  0x44   :  { %1208 = vmatmul.mubr.bf16.gmra.mrb[16].mxu1 %v2093_v4  ;;  %1118 = vmatprep.mubr.bf16.mxu0 %v2098_v8  ;;  %v2177_v4 = vld [vmem:[%s2789_s0 + $0x20c] ss:$36 sps:$4 sm:$0xff]   ;;  %v2184_v8 = vld [vmem:[%s2789_s0 + $0x20] ss:$36 sps:$4 sm:$0xff]  }
  0x45   :  { %1215 = vmatprep.mubr.bf16.mxu1 %v2100_v9  ;;  %v2185_v9 = vld [vmem:[%s2789_s0 + $0x140] ss:$36 sps:$4 sm:$0xff]  }
  0x4b   :  { %1119 = vmatmul.mubr.bf16.gmra.mrb[20].mxu0 %v2102_v12  ;;  %v2188_v12 = vld [vmem:[%s2789_s0 + $0xb0] ss:$36 sps:$4 sm:$0xff]  }
  0x4c   :  { %1216 = vmatmul.mubr.bf16.gmra.mrb[20].mxu1 %v2103_v15  ;;  %1126 = vmatprep.mubr.bf16.mxu0 %v2108_v16  ;;  %v2191_v15 = vld [vmem:[%s2789_s0 + $0x218] ss:$36 sps:$4 sm:$0xff]  }
  0x4d   :  { %1223 = vmatprep.mubr.bf16.mxu1 %v2110_v17 }
  0x53   :  { %1127 = vmatmul.mubr.bf16.gmra.mrb[24].mxu0 %v2112_v22 }
  0x54   :  { %1224 = vmatmul.mubr.bf16.gmra.mrb[24].mxu1 %v2113_v23  ;;  %1134 = vmatprep.mubr.bf16.mxu0 %v2118_v24 }
  0x55   :  { %1231 = vmatprep.mubr.bf16.mxu1 %v2120_v25 }
  0x5b   :  { %1135 = vmatmul.mubr.bf16.gmra.mrb[28].mxu0 %v2122_v30 }
  0x5c   :  { %1232 = vmatmul.mubr.bf16.gmra.mrb[28].mxu1 %v2123_v31  ;;  %1272 = vmatprep.mubr.bf16.mxu0 %v2130_v33 }
  0x5d   :  { %1369 = vmatprep.mubr.bf16.mxu1 %v2133_v34 }
  0x63   :  { %1273 = vmatmul.mubr.bf16.vlgmr.msra.gmra.mrb[32].mxu0 %v2128_v35 }
  0x64   :  { %1370 = vmatmul.mubr.bf16.vlgmr.msra.gmra.mrb[32].mxu1 %v2131_v36  ;;  %1969 = vmatpush3.bf16.msra.mxu0 %v2134_v32 }
  0x65   :  { %2008 = vmatpush3.bf16.msra.mxu1 %v2134_v32  ;;  %1280 = vmatprep.mubr.bf16.mxu0 %v2135_v37 }
  0x66   :  { %1377 = vmatprep.mubr.bf16.mxu1 %v2137_v38  ;;  %1970 = vmatprep.subr.bf16.mxu0 %v2141_v39 }
  0x67   :  { %2001 = vmatprep.subr.bf16.mxu1 %v2141_v39 }
  0x68   :  { %1971 = vmatpush3.bf16.msra.mxu0 %v2141_v39 }
  0x69   :  { %2009 = vmatpush3.bf16.msra.mxu1 %v2141_v39  ;;  %1972 = vmatprep.subr.bf16.mxu0 %v2148_v40 }
  0x6a   :  { %2002 = vmatprep.subr.bf16.mxu1 %v2148_v40 }
  0x6b   :  { %1281 = vmatmul.mubr.bf16.gmra.mrb[36].mxu0 %v2139_v41 }
  0x6c   :  { %1378 = vmatmul.mubr.bf16.gmra.mrb[36].mxu1 %v2140_v42  ;;  %1288 = vmatprep.mubr.bf16.mxu0 %v2142_v43 }
  0x6d   :  { %1385 = vmatprep.mubr.bf16.mxu1 %v2144_v44  ;;  %1973 = vmatpush3.bf16.msra.mxu0 %v2148_v40 }
  0x6e   :  { %2010 = vmatpush3.bf16.msra.mxu1 %v2148_v40  ;;  %1974 = vmatprep.subr.bf16.mxu0 %v2155_v45 }
  0x6f   :  { %2003 = vmatprep.subr.bf16.mxu1 %v2155_v45 }
  0x71   :  { %1975 = vmatpush3.bf16.msra.mxu0 %v2155_v45 }
  0x72   :  { %2011 = vmatpush3.bf16.msra.mxu1 %v2155_v45  ;;  %1976 = vmatprep.subr.bf16.mxu0 %v2162_v46 }
  0x73   :  { %1289 = vmatmul.mubr.bf16.gmra.mrb[40].mxu0 %v2146_v47  ;;  %2004 = vmatprep.subr.bf16.mxu1 %v2162_v46 }
  0x74   :  { %1386 = vmatmul.mubr.bf16.gmra.mrb[40].mxu1 %v2147_v48  ;;  %1296 = vmatprep.mubr.bf16.mxu0 %v2149_v49 }
  0x75   :  { %1393 = vmatprep.mubr.bf16.mxu1 %v2151_v50  ;;  %1977 = vmatpush3.bf16.msra.mxu0 %v2162_v46 }
  0x76   :  { %2012 = vmatpush3.bf16.msra.mxu1 %v2162_v46  ;;  %1978 = vmatprep.subr.bf16.mxu0 %v2169_v51 }
  0x77   :  { %2005 = vmatprep.subr.bf16.mxu1 %v2169_v51 }
  0x79   :  { %1979 = vmatpush3.bf16.msra.mxu0 %v2169_v51 }
  0x7a   :  { %2013 = vmatpush3.bf16.msra.mxu1 %v2169_v51  ;;  %1980 = vmatprep.subr.bf16.mxu0 %v2176_v53 }
  0x7b   :  { %1297 = vmatmul.mubr.bf16.gmra.mrb[44].mxu0 %v2153_v52  ;;  %2006 = vmatprep.subr.bf16.mxu1 %v2176_v53 }
  0x7c   :  { %1394 = vmatmul.mubr.bf16.gmra.mrb[44].mxu1 %v2154_v54  ;;  %1304 = vmatprep.mubr.bf16.mxu0 %v2156_v55 }
  0x7d   :  { %1401 = vmatprep.mubr.bf16.mxu1 %v2158_v56  ;;  %1981 = vmatpush3.bf16.msra.mxu0 %v2176_v53 }
  0x7e   :  { %2014 = vmatpush3.bf16.msra.mxu1 %v2176_v53  ;;  %1982 = vmatprep.subr.bf16.mxu0 %v2183_v57 }
  0x7f   :  { %2007 = vmatprep.subr.bf16.mxu1 %v2183_v57 }
  0x81   :  { %1983 = vmatpush3.bf16.msra.mxu0 %v2183_v57 }
  0x82   :  { %2015 = vmatpush3.bf16.msra.mxu1 %v2183_v57 }
  0x83   :  { %1305 = vmatmul.mubr.bf16.gmra.mrb[48].mxu0 %v2160_v58 }
  0x84   :  { %1402 = vmatmul.mubr.bf16.gmra.mrb[48].mxu1 %v2161_v59  ;;  %1312 = vmatprep.mubr.bf16.mxu0 %v2163_v60 }
  0x85   :  { %1409 = vmatprep.mubr.bf16.mxu1 %v2165_v61 }
  0x8b   :  { %1313 = vmatmul.mubr.bf16.gmra.mrb[52].mxu0 %v2167_v62 }
  0x8c   :  { %1410 = vmatmul.mubr.bf16.gmra.mrb[52].mxu1 %v2168_v63  ;;  %1320 = vmatprep.mubr.bf16.mxu0 %v2170_v0 }
  0x8d   :  { %1417 = vmatprep.mubr.bf16.mxu1 %v2172_v1 }
  0x93   :  { %1321 = vmatmul.mubr.bf16.gmra.mrb[56].mxu0 %v2174_v2 }
  0x94   :  { %1418 = vmatmul.mubr.bf16.gmra.mrb[56].mxu1 %v2175_v3  ;;  %1328 = vmatprep.mubr.bf16.mxu0 %v2177_v4 }
  0x95   :  { %1425 = vmatprep.mubr.bf16.mxu1 %v2179_v5 }
  0x9b   :  { %1329 = vmatmul.mubr.bf16.gmra.mrb[60].mxu0 %v2181_v6 }
  0x9c   :  { %1426 = vmatmul.mubr.bf16.gmra.mrb[60].mxu1 %v2182_v7  ;;  %1984 = vmatprep.mubr.bf16.mxu0 %v2184_v8 }
  0x9d   :  { %1992 = vmatprep.mubr.bf16.mxu1 %v2185_v9 }
  0xa3   :  { %1985 = vmatmul.mubr.bf16.vlgmr.msra.gmra.mrb[64].mxu0 %v2186_v10 }
  0xa4   :  { %1993 = vmatmul.mubr.bf16.vlgmr.msra.gmra.mrb[64].mxu1 %v2187_v11  ;;  %1988 = vmatprep.mubr.bf16.mxu0 %v2188_v12 }
  0xa5   :  { %1996 = vmatprep.mubr.bf16.mxu1 %v2189_v13 }
  0xab   :  { %1989 = vmatmul.mubr.bf16.gmra.mrb[68].mxu0 %v2190_v14 }
  0xac   :  { %1997 = vmatmul.mubr.bf16.gmra.mrb[68].mxu1 %v2191_v15 }
  0xf6   :  { %v1712_v16 = vpop.f32.mrb[0].mxu0 }
  0xf7   :  { %v1776_v17 = vpop.f32.mrb[0].mxu1  ;;  %v1713_v19 = vpop.f32.mrb[1].mxu0 }
  0xf8   :  { %v1714_v20 = vadd.f32 %v1713_v19, %v1712_v16  ;;  %v1777_v21 = vpop.f32.mrb[1].mxu1  ;;  %v1715_v22 = vpop.f32.mrb[2].mxu0 }
  0xf9   :  { %v1778_v23 = vadd.f32 %v1777_v21, %v1776_v17  ;;  %v1779_v24 = vpop.f32.mrb[2].mxu1  ;;  %v1716_v25 = vpop.f32.mrb[3].mxu0 }
  0xfa   :  { %v1081_v26 = vadd.f32 %v1714_v20, %v2647_v18  ;;  %v1717_v27 = vadd.f32 %v1716_v25, %v1715_v22  ;;  %v1780_v28 = vpop.f32.mrb[3].mxu1 }
  0xfb   :  { %v1781_v29 = vadd.f32 %v1780_v28, %v1779_v24 }
  0xfc   :  { %v2650_v30 = vadd.f32 %v1778_v23, %v1081_v26  ;;  %v1084_v31 = vadd.f32 %v1717_v27, %v2647_v18 }
  0xfe   :  { %v2653_v32 = vadd.f32 %v1781_v29, %v1084_v31  ;;  %v1718_v33 = vpop.f32.mrb[4].mxu0 }
  0xff   :  { %v1782_v34 = vpop.f32.mrb[4].mxu1  ;;  %v1719_v35 = vpop.f32.mrb[5].mxu0 }
 0x100   :  { %v1720_v36 = vadd.f32 %v1719_v35, %v1718_v33  ;;  %v1783_v37 = vpop.f32.mrb[5].mxu1  ;;  %v1721_v38 = vpop.f32.mrb[6].mxu0 }
 0x101   :  { %v1784_v39 = vadd.f32 %v1783_v37, %v1782_v34  ;;  %v1785_v40 = vpop.f32.mrb[6].mxu1  ;;  %v1722_v41 = vpop.f32.mrb[7].mxu0 }
 0x102   :  { %v1089_v42 = vadd.f32 %v1720_v36, %v2647_v18  ;;  %v1723_v43 = vadd.f32 %v1722_v41, %v1721_v38  ;;  %v1786_v44 = vpop.f32.mrb[7].mxu1 }
 0x103   :  { %v1787_v45 = vadd.f32 %v1786_v44, %v1785_v40 }
 0x104   :  { %v2656_v46 = vadd.f32 %v1784_v39, %v1089_v42  ;;  %v1092_v47 = vadd.f32 %v1723_v43, %v2647_v18 }
 0x106   :  { %v2659_v48 = vadd.f32 %v1787_v45, %v1092_v47  ;;  %v1724_v49 = vpop.f32.mrb[8].mxu0 }
 0x107   :  { %v1788_v50 = vpop.f32.mrb[8].mxu1  ;;  %v1725_v51 = vpop.f32.mrb[9].mxu0 }
 0x108   :  { %v1726_v52 = vadd.f32 %v1725_v51, %v1724_v49  ;;  %v1789_v53 = vpop.f32.mrb[9].mxu1  ;;  %v1727_v54 = vpop.f32.mrb[10].mxu0 }
 0x109   :  { %v1790_v55 = vadd.f32 %v1789_v53, %v1788_v50  ;;  %v1791_v56 = vpop.f32.mrb[10].mxu1  ;;  %v1728_v57 = vpop.f32.mrb[11].mxu0 }
 0x10a   :  { %v1097_v58 = vadd.f32 %v1726_v52, %v2647_v18  ;;  %v1729_v59 = vadd.f32 %v1728_v57, %v1727_v54  ;;  %v1792_v60 = vpop.f32.mrb[11].mxu1 }
 0x10b   :  { %v1793_v61 = vadd.f32 %v1792_v60, %v1791_v56 }
 0x10c   :  { %v2662_v62 = vadd.f32 %v1790_v55, %v1097_v58  ;;  %v1100_v63 = vadd.f32 %v1729_v59, %v2647_v18 }
 0x10e   :  { %v2665_v0 = vadd.f32 %v1793_v61, %v1100_v63  ;;  %v1730_v1 = vpop.f32.mrb[12].mxu0 }
 0x10f   :  { %v1794_v2 = vpop.f32.mrb[12].mxu1  ;;  %v1731_v3 = vpop.f32.mrb[13].mxu0 }
 0x110   :  { %v1732_v4 = vadd.f32 %v1731_v3, %v1730_v1  ;;  %v1795_v5 = vpop.f32.mrb[13].mxu1  ;;  %v1733_v6 = vpop.f32.mrb[14].mxu0 }
 0x111   :  { %v1796_v7 = vadd.f32 %v1795_v5, %v1794_v2  ;;  %v1797_v8 = vpop.f32.mrb[14].mxu1  ;;  %v1734_v9 = vpop.f32.mrb[15].mxu0 }
 0x112   :  { %v1105_v10 = vadd.f32 %v1732_v4, %v2647_v18  ;;  %v1735_v11 = vadd.f32 %v1734_v9, %v1733_v6  ;;  %v1798_v12 = vpop.f32.mrb[15].mxu1 }
 0x113   :  { %v1799_v13 = vadd.f32 %v1798_v12, %v1797_v8 }
 0x114   :  { %v2668_v14 = vadd.f32 %v1796_v7, %v1105_v10  ;;  %v1108_v15 = vadd.f32 %v1735_v11, %v2647_v18 }
 0x116   :  { %v2671_v16 = vadd.f32 %v1799_v13, %v1108_v15  ;;  %v1736_v17 = vpop.f32.mrb[16].mxu0 }
 0x117   :  { %v1800_v19 = vpop.f32.mrb[16].mxu1  ;;  %v1737_v20 = vpop.f32.mrb[17].mxu0 }
 0x118   :  { %v1738_v21 = vadd.f32 %v1737_v20, %v1736_v17  ;;  %v1801_v22 = vpop.f32.mrb[17].mxu1  ;;  %v1739_v23 = vpop.f32.mrb[18].mxu0 }
 0x119   :  { %v1802_v24 = vadd.f32 %v1801_v22, %v1800_v19  ;;  %v1803_v25 = vpop.f32.mrb[18].mxu1  ;;  %v1740_v26 = vpop.f32.mrb[19].mxu0 }
 0x11a   :  { %v1113_v27 = vadd.f32 %v1738_v21, %v2647_v18  ;;  %v1741_v28 = vadd.f32 %v1740_v26, %v1739_v23  ;;  %v1804_v29 = vpop.f32.mrb[19].mxu1 }
 0x11b   :  { %v1805_v31 = vadd.f32 %v1804_v29, %v1803_v25 }
 0x11c   :  { %v2674_v33 = vadd.f32 %v1802_v24, %v1113_v27  ;;  %v1116_v34 = vadd.f32 %v1741_v28, %v2647_v18 }
 0x11e   :  { %v2677_v35 = vadd.f32 %v1805_v31, %v1116_v34  ;;  %v1742_v36 = vpop.f32.mrb[20].mxu0 }
 0x11f   :  { %v1806_v37 = vpop.f32.mrb[20].mxu1  ;;  %v1743_v38 = vpop.f32.mrb[21].mxu0 }
 0x120   :  { %v1744_v39 = vadd.f32 %v1743_v38, %v1742_v36  ;;  %v1807_v40 = vpop.f32.mrb[21].mxu1  ;;  %v1745_v41 = vpop.f32.mrb[22].mxu0 }
 0x121   :  { %v1808_v42 = vadd.f32 %v1807_v40, %v1806_v37  ;;  %v1809_v43 = vpop.f32.mrb[22].mxu1  ;;  %v1746_v44 = vpop.f32.mrb[23].mxu0 }
 0x122   :  { %v1121_v45 = vadd.f32 %v1744_v39, %v2647_v18  ;;  %v1747_v47 = vadd.f32 %v1746_v44, %v1745_v41  ;;  %v1810_v49 = vpop.f32.mrb[23].mxu1 }
 0x123   :  { %v1811_v50 = vadd.f32 %v1810_v49, %v1809_v43 }
 0x124   :  { %v2680_v51 = vadd.f32 %v1808_v42, %v1121_v45  ;;  %v1124_v52 = vadd.f32 %v1747_v47, %v2647_v18 }
 0x126   :  { %v2683_v53 = vadd.f32 %v1811_v50, %v1124_v52  ;;  %v1748_v54 = vpop.f32.mrb[24].mxu0 }
 0x127   :  { %v1812_v55 = vpop.f32.mrb[24].mxu1  ;;  %v1749_v56 = vpop.f32.mrb[25].mxu0 }
 0x128   :  { %v1750_v57 = vadd.f32 %v1749_v56, %v1748_v54  ;;  %v1813_v58 = vpop.f32.mrb[25].mxu1  ;;  %v1751_v59 = vpop.f32.mrb[26].mxu0 }
 0x129   :  { %v1814_v60 = vadd.f32 %v1813_v58, %v1812_v55  ;;  %v1815_v61 = vpop.f32.mrb[26].mxu1  ;;  %v1752_v63 = vpop.f32.mrb[27].mxu0 }
 0x12a   :  { %v1129_v1 = vadd.f32 %v1750_v57, %v2647_v18  ;;  %v1753_v2 = vadd.f32 %v1752_v63, %v1751_v59  ;;  %v1816_v3 = vpop.f32.mrb[27].mxu1 }
 0x12b   :  { %v1817_v4 = vadd.f32 %v1816_v3, %v1815_v61 }
 0x12c   :  { %v2686_v5 = vadd.f32 %v1814_v60, %v1129_v1  ;;  %v1132_v6 = vadd.f32 %v1753_v2, %v2647_v18 }
 0x12e   :  { %v2689_v7 = vadd.f32 %v1817_v4, %v1132_v6  ;;  %v1754_v8 = vpop.f32.mrb[28].mxu0 }
 0x12f   :  { %v1818_v9 = vpop.f32.mrb[28].mxu1  ;;  %v1755_v10 = vpop.f32.mrb[29].mxu0 }
 0x130   :  { %v1756_v11 = vadd.f32 %v1755_v10, %v1754_v8  ;;  %v1819_v12 = vpop.f32.mrb[29].mxu1  ;;  %v1757_v13 = vpop.f32.mrb[30].mxu0 }
 0x131   :  { %v1820_v15 = vadd.f32 %v1819_v12, %v1818_v9  ;;  %v1821_v17 = vpop.f32.mrb[30].mxu1  ;;  %v1758_v19 = vpop.f32.mrb[31].mxu0 }
 0x132   :  { %v1137_v20 = vadd.f32 %v1756_v11, %v2647_v18  ;;  %v1759_v21 = vadd.f32 %v1758_v19, %v1757_v13  ;;  %v1822_v22 = vpop.f32.mrb[31].mxu1 }
 0x133   :  { %v1823_v23 = vadd.f32 %v1822_v22, %v1821_v17 }
 0x134   :  { %v2692_v24 = vadd.f32 %v1820_v15, %v1137_v20  ;;  %v1140_v25 = vadd.f32 %v1759_v21, %v2647_v18 }
 0x136   :  { %v2695_v26 = vadd.f32 %v1823_v23, %v1140_v25  ;;  %v1840_v27 = vpop.f32.mrb[32].mxu0 }
 0x137   :  { %v1904_v28 = vpop.f32.mrb[32].mxu1  ;;  %v1841_v29 = vpop.f32.mrb[33].mxu0 }
 0x138   :  { %v1842_v31 = vadd.f32 %v1841_v29, %v1840_v27  ;;  %v1905_v34 = vpop.f32.mrb[33].mxu1  ;;  %v1843_v36 = vpop.f32.mrb[34].mxu0 }
 0x139   :  { %v1906_v37 = vadd.f32 %v1905_v34, %v1904_v28  ;;  %v1907_v38 = vpop.f32.mrb[34].mxu1  ;;  %v1844_v39 = vpop.f32.mrb[35].mxu0 }
 0x13a   :  { %v1275_v40 = vadd.f32 %v1842_v31, %v2650_v30  ;;  %v1845_v41 = vadd.f32 %v1844_v39, %v1843_v36  ;;  %v1908_v42 = vpop.f32.mrb[35].mxu1 }
 0x13b   :  { %v1909_v43 = vadd.f32 %v1908_v42, %v1907_v38 }
 0x13c   :  { %v1278_v44 = vadd.f32 %v1845_v41, %v2653_v32  ;;  %v2699_v45 = vadd.f32 %v1906_v37, %v1275_v40 }
 0x13e   :  { %v1846_v18 = vpop.f32.mrb[36].mxu0  ;;  %v2701_v47 = vadd.f32 %v1909_v43, %v1278_v44 }
 0x13f   :  { %v1910_v49 = vpop.f32.mrb[36].mxu1  ;;  %v1847_v50 = vpop.f32.mrb[37].mxu0 }
 0x140   :  { %v1848_v52 = vadd.f32 %v1847_v50, %v1846_v18  ;;  %v1911_v54 = vpop.f32.mrb[37].mxu1  ;;  %v1849_v55 = vpop.f32.mrb[38].mxu0 }
 0x141   :  { %v1912_v56 = vadd.f32 %v1911_v54, %v1910_v49  ;;  %v1913_v57 = vpop.f32.mrb[38].mxu1  ;;  %v1850_v58 = vpop.f32.mrb[39].mxu0 }
 0x142   :  { %v1283_v30 = vadd.f32 %v1848_v52, %v2656_v46  ;;  %v1851_v59 = vadd.f32 %v1850_v58, %v1849_v55  ;;  %v1914_v60 = vpop.f32.mrb[39].mxu1 }
 0x143   :  { %v1915_v61 = vadd.f32 %v1914_v60, %v1913_v57 }
 0x144   :  { %v1286_v32 = vadd.f32 %v1851_v59, %v2659_v48  ;;  %v2705_v63 = vadd.f32 %v1912_v56, %v1283_v30 }
 0x146   :  { %v1852_v1 = vpop.f32.mrb[40].mxu0  ;;  %v2707_v2 = vadd.f32 %v1915_v61, %v1286_v32 }
 0x147   :  { %v1916_v3 = vpop.f32.mrb[40].mxu1  ;;  %v1853_v4 = vpop.f32.mrb[41].mxu0 }
 0x148   :  { %v1854_v6 = vadd.f32 %v1853_v4, %v1852_v1  ;;  %v1917_v8 = vpop.f32.mrb[41].mxu1  ;;  %v1855_v9 = vpop.f32.mrb[42].mxu0 }
 0x149   :  { %v1918_v10 = vadd.f32 %v1917_v8, %v1916_v3  ;;  %v1919_v11 = vpop.f32.mrb[42].mxu1  ;;  %v1856_v12 = vpop.f32.mrb[43].mxu0 }
 0x14a   :  { %v1291_v46 = vadd.f32 %v1854_v6, %v2662_v62  ;;  %v1857_v13 = vadd.f32 %v1856_v12, %v1855_v9  ;;  %v1920_v15 = vpop.f32.mrb[43].mxu1 }
 0x14b   :  { %v1921_v17 = vadd.f32 %v1920_v15, %v1919_v11 }
 0x14c   :  { %v1294_v48 = vadd.f32 %v1857_v13, %v2665_v0  ;;  %v2711_v19 = vadd.f32 %v1918_v10, %v1291_v46 }
 0x14e   :  { %v1858_v20 = vpop.f32.mrb[44].mxu0  ;;  %v2713_v21 = vadd.f32 %v1921_v17, %v1294_v48 }
 0x14f   :  { %v1922_v22 = vpop.f32.mrb[44].mxu1  ;;  %v1859_v23 = vpop.f32.mrb[45].mxu0 }
 0x150   :  { %v1860_v25 = vadd.f32 %v1859_v23, %v1858_v20  ;;  %v1923_v27 = vpop.f32.mrb[45].mxu1  ;;  %v1861_v28 = vpop.f32.mrb[46].mxu0 }
 0x151   :  { %v1924_v29 = vadd.f32 %v1923_v27, %v1922_v22  ;;  %v1925_v31 = vpop.f32.mrb[46].mxu1  ;;  %v1862_v34 = vpop.f32.mrb[47].mxu0 }
 0x152   :  { %v1299_v62 = vadd.f32 %v1860_v25, %v2668_v14  ;;  %v1863_v36 = vadd.f32 %v1862_v34, %v1861_v28  ;;  %v1926_v37 = vpop.f32.mrb[47].mxu1 }
 0x153   :  { %v1927_v38 = vadd.f32 %v1926_v37, %v1925_v31 }
 0x154   :  { %v1302_v0 = vadd.f32 %v1863_v36, %v2671_v16  ;;  %v2717_v39 = vadd.f32 %v1924_v29, %v1299_v62 }
 0x156   :  { %v1864_v40 = vpop.f32.mrb[48].mxu0  ;;  %v2719_v41 = vadd.f32 %v1927_v38, %v1302_v0 }
 0x157   :  { %v1928_v42 = vpop.f32.mrb[48].mxu1  ;;  %v1865_v43 = vpop.f32.mrb[49].mxu0 }
 0x158   :  { %v1866_v44 = vadd.f32 %v1865_v43, %v1864_v40  ;;  %v1929_v18 = vpop.f32.mrb[49].mxu1  ;;  %v1867_v49 = vpop.f32.mrb[50].mxu0 }
 0x159   :  { %v1930_v50 = vadd.f32 %v1929_v18, %v1928_v42  ;;  %v1931_v52 = vpop.f32.mrb[50].mxu1  ;;  %v1868_v54 = vpop.f32.mrb[51].mxu0 }
 0x15a   :  { %v1307_v14 = vadd.f32 %v1866_v44, %v2674_v33  ;;  %v1869_v55 = vadd.f32 %v1868_v54, %v1867_v49  ;;  %v1932_v56 = vpop.f32.mrb[51].mxu1 }
 0x15b   :  { %v1933_v57 = vadd.f32 %v1932_v56, %v1931_v52 }
 0x15c   :  { %v1310_v16 = vadd.f32 %v1869_v55, %v2677_v35  ;;  %v1404_v58 = vadd.f32 %v1930_v50, %v1307_v14 }
 0x15e   :  { %v1870_v30 = vpop.f32.mrb[52].mxu0  ;;  %v2723_v59 = vadd.f32 %v1933_v57, %v1310_v16 }
 0x15f   :  { %v1934_v60 = vpop.f32.mrb[52].mxu1  ;;  %v1871_v61 = vpop.f32.mrb[53].mxu0 }
 0x160   :  { %v1872_v32 = vadd.f32 %v1871_v61, %v1870_v30  ;;  %v1935_v1 = vpop.f32.mrb[53].mxu1  ;;  %v1873_v3 = vpop.f32.mrb[54].mxu0 }
 0x161   :  { %v1936_v4 = vadd.f32 %v1935_v1, %v1934_v60  ;;  %v1937_v6 = vpop.f32.mrb[54].mxu1  ;;  %v1874_v8 = vpop.f32.mrb[55].mxu0 }
 0x162   :  { %v1315_v9 = vadd.f32 %v1872_v32, %v2680_v51  ;;  %v1875_v33 = vadd.f32 %v1874_v8, %v1873_v3  ;;  %v1938_v10 = vpop.f32.mrb[55].mxu1 }
 0x163   :  { %v1939_v11 = vadd.f32 %v1938_v10, %v1937_v6 }
 0x164   :  { %v1318_v12 = vadd.f32 %v1875_v33, %v2683_v53  ;;  %v1412_v35 = vadd.f32 %v1936_v4, %v1315_v9 }
 0x166   :  { %v1876_v46 = vpop.f32.mrb[56].mxu0  ;;  %v1415_v13 = vadd.f32 %v1939_v11, %v1318_v12 }
 0x167   :  { %v1940_v15 = vpop.f32.mrb[56].mxu1  ;;  %v1877_v17 = vpop.f32.mrb[57].mxu0 }
 0x168   :  { %v1878_v48 = vadd.f32 %v1877_v17, %v1876_v46  ;;  %v1941_v20 = vpop.f32.mrb[57].mxu1  ;;  %v1879_v22 = vpop.f32.mrb[58].mxu0 }
 0x169   :  { %v1942_v23 = vadd.f32 %v1941_v20, %v1940_v15  ;;  %v1943_v25 = vpop.f32.mrb[58].mxu1  ;;  %v1880_v27 = vpop.f32.mrb[59].mxu0 }
 0x16a   :  { %v1323_v28 = vadd.f32 %v1878_v48, %v2686_v5  ;;  %v1881_v29 = vadd.f32 %v1880_v27, %v1879_v22  ;;  %v1944_v51 = vpop.f32.mrb[59].mxu1 }
 0x16b   :  { %v1945_v31 = vadd.f32 %v1944_v51, %v1943_v25 }
 0x16c   :  { %v1326_v34 = vadd.f32 %v1881_v29, %v2689_v7  ;;  %v1420_v62 = vadd.f32 %v1942_v23, %v1323_v28 }
 0x16e   :  { %v1882_v53 = vpop.f32.mrb[60].mxu0  ;;  %v1423_v36 = vadd.f32 %v1945_v31, %v1326_v34 }
 0x16f   :  { %v1946_v37 = vpop.f32.mrb[60].mxu1  ;;  %v1883_v38 = vpop.f32.mrb[61].mxu0 }
 0x170   :  { %v1884_v0 = vadd.f32 %v1883_v38, %v1882_v53  ;;  %v1947_v40 = vpop.f32.mrb[61].mxu1  ;;  %v1885_v42 = vpop.f32.mrb[62].mxu0 }
 0x171   :  { %v1948_v43 = vadd.f32 %v1947_v40, %v1946_v37  ;;  %v1949_v44 = vpop.f32.mrb[62].mxu1  ;;  %v1886_v18 = vpop.f32.mrb[63].mxu0 }
 0x172   :  { %v1331_v49 = vadd.f32 %v1884_v0, %v2692_v24  ;;  %v1887_v50 = vadd.f32 %v1886_v18, %v1885_v42  ;;  %v1950_v5 = vpop.f32.mrb[63].mxu1 }
 0x173   :  { %v1951_v52 = vadd.f32 %v1950_v5, %v1949_v44 }
 0x174   :  { %v1334_v54 = vadd.f32 %v1887_v50, %v2695_v26  ;;  %v1428_v14 = vadd.f32 %v1948_v43, %v1331_v49 }
 0x176   :  { %v1986_v7 = vpop.f32.mrb[64].mxu0  ;;  %v1431_v55 = vadd.f32 %v1951_v52, %v1334_v54 }
 0x177   :  { %v1477_v56 = vadd.f32 %v1986_v7, %v2705_v63  ;;  %v1994_v57 = vpop.f32.mrb[64].mxu1  ;;  %v1468_v16 = vpop.f32.mrb[65].mxu0 }
 0x178   :  { %v1509_v30 = vadd.f32 %v1994_v57, %v1412_v35  ;;  %v1469_v60 = vadd.f32 %v1468_v16, %v2699_v45  ;;  %v1500_v61 = vpop.f32.mrb[65].mxu1  ;;  %v1987_v32 = vpop.f32.mrb[66].mxu0 }
 0x179   :  { %1533 = vst [vmem:[%s2791_s3 + $0x10] sm:$0xff] %v1477_v56  ;;  %v1501_v24 = vadd.f32 %v1500_v61, %v1404_v58  ;;  %v1480_v1 = vadd.f32 %v1987_v32, %v2707_v2  ;;  %v1995_v26 = vpop.f32.mrb[66].mxu1  ;;  %v1471_v3 = vpop.f32.mrb[67].mxu0 }
 0x17a   :  { %1541 = vst [vmem:[%s2791_s3 + $0x50] sm:$0xff] %v1509_v30  ;;  %1531 = vst [vmem:[%s2791_s3] sm:$0xff] %v1469_v60  ;;  %v1512_v45 = vadd.f32 %v1995_v26, %v1415_v13  ;;  %v1472_v63 = vadd.f32 %v1471_v3, %v2701_v47  ;;  %v1503_v4 = vpop.f32.mrb[67].mxu1 }
 0x17b   :  { %1539 = vst [vmem:[%s2791_s3 + $0x40] sm:$0xff] %v1501_v24  ;;  %1534 = vst [vmem:[%s2791_s3 + $0x18] sm:$0xff] %v1480_v1  ;;  %v1504_v2 = vadd.f32 %v1503_v4, %v2723_v59 }
 0x17c   :  { %1542 = vst [vmem:[%s2791_s3 + $0x58] sm:$0xff] %v1512_v45  ;;  %1532 = vst [vmem:[%s2791_s3 + $0x8] sm:$0xff] %v1472_v63 }
 0x17d   :  { %1540 = vst [vmem:[%s2791_s3 + $0x48] sm:$0xff] %v1504_v2 }
 0x17e   :  { %v1990_v47 = vpop.f32.mrb[68].mxu0 }
 0x17f   :  { %v1493_v58 = vadd.f32 %v1990_v47, %v2717_v39  ;;  %v1998_v6 = vpop.f32.mrb[68].mxu1  ;;  %v1484_v8 = vpop.f32.mrb[69].mxu0 }
 0x180   :  { %v1525_v9 = vadd.f32 %v1998_v6, %v1428_v14  ;;  %v1485_v59 = vadd.f32 %v1484_v8, %v2711_v19  ;;  %v1516_v33 = vpop.f32.mrb[69].mxu1  ;;  %v1991_v10 = vpop.f32.mrb[70].mxu0 }
 0x181   :  { %1537 = vst [vmem:[%s2791_s3 + $0x30] sm:$0xff] %v1493_v58  ;;  %v1517_v11 = vadd.f32 %v1516_v33, %v1420_v62  ;;  %v1496_v12 = vadd.f32 %v1991_v10, %v2719_v41  ;;  %v1999_v35 = vpop.f32.mrb[70].mxu1  ;;  %v1487_v46 = vpop.f32.mrb[71].mxu0 }
 0x182   :  { %1545 = vst [vmem:[%s2791_s3 + $0x70] sm:$0xff] %v1525_v9  ;;  %1535 = vst [vmem:[%s2791_s3 + $0x20] sm:$0xff] %v1485_v59  ;;  %v1528_v19 = vadd.f32 %v1999_v35, %v1431_v55  ;;  %v1488_v39 = vadd.f32 %v1487_v46, %v2713_v21  ;;  %v1519_v13 = vpop.f32.mrb[71].mxu1 }
 0x183   :  { %1543 = vst [vmem:[%s2791_s3 + $0x60] sm:$0xff] %v1517_v11  ;;  %1538 = vst [vmem:[%s2791_s3 + $0x38] sm:$0xff] %v1496_v12  ;;  %v1520_v41 = vadd.f32 %v1519_v13, %v1423_v36 }
 0x184   :  { %1546 = vst [vmem:[%s2791_s3 + $0x78] sm:$0xff] %v1528_v19  ;;  %1536 = vst [vmem:[%s2791_s3 + $0x28] sm:$0xff] %v1488_v39 }
 0x185   :  { %1544 = vst [vmem:[%s2791_s3 + $0x68] sm:$0xff] %v1520_v41 }

</bundles_post_ra>
